<compile_context>
chip_gen: v6e
topology: v6e:2x2x1
jax: 0.10.0
libtpu: 0.0.40
codegen_flags: <defaults>
</compile_context>

<pallas_src>
import math

import jax
import jax.numpy as jnp
from jax.experimental import pallas as pl
from jax.experimental.pallas import tpu as pltpu


_LANE = 128      # vreg lane width / minimum MXU alignment
_SUBLANE = 8     # f32 sublane count


def _round_up(x, m):
    return (x + m - 1) // m * m


def _cdiv(a, b):
    return (a + b - 1) // b


# ---------------------------------------------------------------------------
# Kernel
# ---------------------------------------------------------------------------
def _make_linear_kernel(mode):
    """Builds the kernel body for one of three matmul modes.

    mode == "high":    x f32, weight as (hi, lo) bf16 split -> 3 MXU passes.
    mode == "highest": x f32, weight f32, Precision.HIGHEST  -> 6 MXU passes.
    mode == "bf16":    x bf16, weight bf16                   -> 1 MXU pass.
    """

    def kernel(*refs):
        if mode == "high":
            x_ref, wh_ref, wl_ref, b_ref, o_ref, acc_ref = refs
        else:
            x_ref, wh_ref, b_ref, o_ref, acc_ref = refs

        k = pl.program_id(1)

        @pl.when(k == 0)
        def _():
            acc_ref[...] = jnp.zeros_like(acc_ref)

        if mode == "high":
            # bf16_3x-equivalent: split x into bf16 hi/lo on-chip (weight was
            # split once in param prep); drop only the tiny lo*lo term.
            x = x_ref[...]
            x_hi = x.astype(jnp.bfloat16)
            x_lo = (x - x_hi.astype(jnp.float32)).astype(jnp.bfloat16)
            w_hi = wh_ref[...]
            w_lo = wl_ref[...]
            part = jnp.dot(x_hi, w_hi, preferred_element_type=jnp.float32)
            part = part + jnp.dot(x_lo, w_hi, preferred_element_type=jnp.float32)
            part = part + jnp.dot(x_hi, w_lo, preferred_element_type=jnp.float32)
        elif mode == "highest":
            part = jax.lax.dot_general(
                x_ref[...], wh_ref[...],
                dimension_numbers=(((1,), (0,)), ((), ())),   # (M,K) @ (K,N)
                preferred_element_type=jnp.float32,
                precision=jax.lax.Precision.HIGHEST)
        else:  # "bf16"
            part = jnp.dot(x_ref[...], wh_ref[...],
                           preferred_element_type=jnp.float32)

        acc_ref[...] += part

        @pl.when(k == pl.num_programs(1) - 1)
        def _():
            # Bias add in the f32 accumulator; cast only on the final store.
            o_ref[...] = (acc_ref[...] + b_ref[...]).astype(o_ref.dtype)

    return kernel


# ---------------------------------------------------------------------------
# One-time parameter prep
# ---------------------------------------------------------------------------
def prepare_linear_params(weight, bias, mode="high"):
    """Transpose the PyTorch-layout weight ONCE to (d_in_p, d_out_p), zero-pad
    both dims to multiples of 128, and (mode="high") split into bf16 hi/lo.

    Zero padding is numerically free: padded K rows/cols are zero and padded
    output columns are stripped by the wrapper. Keep that invariant.
    """
    d_out, d_in = weight.shape
    d_in_p = _round_up(d_in, _LANE)
    d_out_p = _round_up(d_out, _LANE)

    w_t = jnp.zeros((d_in_p, d_out_p), jnp.float32)
    w_t = w_t.at[:d_in, :d_out].set(weight.astype(jnp.float32).T)

    b_p = jnp.zeros((1, d_out_p), jnp.float32)
    b_p = b_p.at[0, :d_out].set(bias.astype(jnp.float32))

    if mode == "high":
        w_hi = w_t.astype(jnp.bfloat16)
        w_lo = (w_t - w_hi.astype(jnp.float32)).astype(jnp.bfloat16)
        w_ops = (w_hi, w_lo)            # same total bytes as one f32 weight
    elif mode == "highest":
        w_ops = (w_t,)
    elif mode == "bf16":
        w_ops = (w_t.astype(jnp.bfloat16),)
    else:
        raise ValueError(f"unknown mode: {mode}")
    return w_ops, b_p, d_out


# ---------------------------------------------------------------------------
# Wrapper
# ---------------------------------------------------------------------------
def representation_function(state, weight, bias, *, mode="high",
                            block_m=512,
                            vmem_budget_bytes=40 * 1024 * 1024):
    """Pallas equivalent of nn.Linear(obs_dim, state_dim)(state).

    state:  (B, obs_dim) float32
    weight: (state_dim, obs_dim) float32 (PyTorch Linear layout)
    bias:   (state_dim,) float32
    mode:   "high" (default, 3 bf16 MXU passes), "highest" (6 passes,
            closest to torch f32), "bf16" (1 pass, fastest).
    """
    B, d_in = state.shape
    out_dtype = state.dtype

    w_ops, b_p, d_out = prepare_linear_params(weight, bias, mode)
    d_in_p, d_out_p = w_ops[0].shape
    x_dtype = jnp.bfloat16 if mode == "bf16" else jnp.float32
    x = state.astype(x_dtype)

    # --- batch tiling: balanced tiles (minimal padding); >= 2 tiles when
    # B >= 16 so v7x's two TensorCores both get work on the parallel axis.
    n_m = max(1, _cdiv(B, block_m))
    if n_m == 1 and B >= 2 * _SUBLANE:
        n_m = 2
    tm = _round_up(_cdiv(B, n_m), _SUBLANE)
    b_pad = _round_up(B, tm)
    n_m = b_pad // tm

    # Zero-pad batch and the contraction dim in one shot (K padding is free).
    if (b_pad, d_in_p) != (B, d_in):
        x = jnp.pad(x, ((0, b_pad - B), (0, d_in_p - d_in)))

    # --- K tiling: pick the largest tk (dividing d_in_p) whose double-
    # buffered tile set fits the VMEM budget (safe for v7x's 64 MiB physical,
    # and well above v5e's 16 MiB default scoped limit since we set it below).
    x_item = jnp.dtype(x_dtype).itemsize
    w_item = jnp.dtype(w_ops[0].dtype).itemsize
    o_item = jnp.dtype(out_dtype).itemsize
    n_w = len(w_ops)

    def footprint(tk):
        return (2 * tm * tk * x_item                 # x tiles (double-buffered)
                + 2 * n_w * tk * d_out_p * w_item    # weight tiles
                + 2 * d_out_p * 4                    # bias
                + 2 * tm * d_out_p * o_item          # output tiles
                + tm * d_out_p * 4)                  # f32 accumulator scratch

    tk = d_in_p
    if footprint(tk) > vmem_budget_bytes:
        for m in range(d_in_p // _LANE, 0, -1):
            cand = m * _LANE
            if d_in_p % cand == 0 and footprint(cand) <= vmem_budget_bytes:
                tk = cand
                break
        else:
            tk = _LANE
    n_k = d_in_p // tk

    grid = (n_m, n_k)

    x_spec = pl.BlockSpec((tm, tk), lambda i, k: (i, k))
    w_spec = pl.BlockSpec((tk, d_out_p), lambda i, k: (k, 0))
    b_spec = pl.BlockSpec((1, d_out_p), lambda i, k: (0, 0))
    o_spec = pl.BlockSpec((tm, d_out_p), lambda i, k: (i, 0))
    in_specs = [x_spec] + [w_spec] * n_w + [b_spec]
    # TODO(synk): when n_k == 1 the weight/bias are grid-invariant; a
    # pipeline_mode=pl.Buffered(1) on their specs would halve their VMEM
    # footprint (kept at default double-buffering here for portability).

    passes = {"high": 3, "highest": 6, "bf16": 1}[mode]
    cost = pl.CostEstimate(
        flops=2 * b_pad * d_in_p * d_out_p * passes,
        transcendentals=0,
        bytes_accessed=(b_pad * d_in_p * x_item
                        + n_w * d_in_p * d_out_p * w_item
                        + d_out_p * 4
                        + b_pad * d_out_p * o_item))

    vmem_limit = int(min(max(2 * footprint(tk), 16 * 1024 * 1024),
                         60 * 1024 * 1024))

    out = pl.pallas_call(
        _make_linear_kernel(mode),
        out_shape=jax.ShapeDtypeStruct((b_pad, d_out_p), out_dtype),
        grid=grid,
        in_specs=in_specs,
        out_specs=o_spec,
        scratch_shapes=[pltpu.VMEM((tm, d_out_p), jnp.float32)],
        compiler_params=pltpu.CompilerParams(
            dimension_semantics=("parallel", "arbitrary"),
            vmem_limit_bytes=vmem_limit),
        cost_estimate=cost,
    )(x, *w_ops, b_p)

    # Strip batch / lane padding only if padding was actually added.
    if (b_pad, d_out_p) != (B, d_out):
        out = out[:B, :d_out]
    return out


if __name__ == "__main__":
    # Small shapes consistent with the module's forward.
    batch = 8
    observation_space_dimensions = 64
    state_dimension = 32

    key = jax.random.PRNGKey(0)
    k_x, k_w, k_b = jax.random.split(key, 3)

    # Deterministic init mimicking PyTorch Linear's default
    # uniform(-1/sqrt(fan_in), 1/sqrt(fan_in)).
    bound = 1.0 / math.sqrt(observation_space_dimensions)
    weight = jax.random.uniform(
        k_w, (state_dimension, observation_space_dimensions),
        minval=-bound, maxval=bound, dtype=jnp.float32)
    bias = jax.random.uniform(
        k_b, (state_dimension,), minval=-bound, maxval=bound,
        dtype=jnp.float32)
    state = jax.random.normal(
        k_x, (batch, observation_space_dimensions), dtype=jnp.float32)

    out = representation_function(state, weight, bias)
    out = jax.block_until_ready(out)

    # Reference at HIGHEST precision (TPU f32 matmul is bf16-emulated even at
    # HIGHEST, so exact bitwise parity with torch f32 is not expected).
    ref = jnp.dot(state, weight.T,
                  precision=jax.lax.Precision.HIGHEST) + bias
    assert out.shape == (batch, state_dimension)
    # 3-pass bf16 split matmul: error vs f32 truth is O(1e-6) at these
    # magnitudes; 1e-4 leaves margin while still catching structural bugs.
    err = float(jnp.max(jnp.abs(out - ref)))
    assert jnp.allclose(out, ref, atol=1e-4, rtol=1e-4), err

    print("KERNEL_OK")
</pallas_src>

<mosaic_0001>
module attributes {stable_mosaic.version = 11 : i64} {
  func.func @kernel(%arg0: i32, %arg1: i32, %arg2: memref<8x128xf32, #tpu.memory_space<vmem>>, %arg3: memref<128x128xbf16, #tpu.memory_space<vmem>>, %arg4: memref<128x128xbf16, #tpu.memory_space<vmem>>, %arg5: memref<1x128xf32, #tpu.memory_space<vmem>>, %arg6: memref<8x128xf32, #tpu.memory_space<vmem>>, %arg7: memref<8x128xf32, #tpu.memory_space<vmem>>) attributes {dimension_semantics = [#tpu.dimension_semantics<parallel>, #tpu.dimension_semantics<arbitrary>], iteration_bounds = array<i64: 1, 1>, scalar_prefetch = 0 : i64, scratch_operands = 1 : i64, tpu.core_type = #tpu.core_type<tc>, window_params = [{transform_indices = @transform_0, window_bounds = array<i64: 8, 128>}, {transform_indices = @transform_1, window_bounds = array<i64: 128, 128>}, {transform_indices = @transform_2, window_bounds = array<i64: 128, 128>}, {pipeline_mode = #tpu.pipeline_mode<synchronous>, transform_indices = @transform_3, window_bounds = array<i64: 1, 128>}, {transform_indices = @transform_4, window_bounds = array<i64: 8, 128>}]} {
    %c0_i32 = arith.constant 0 : i32
    %0 = arith.cmpi eq, %arg1, %c0_i32 : i32
    %1 = arith.extui %0 : i1 to i32
    %c0_i32_0 = arith.constant 0 : i32
    %2 = arith.cmpi ne, %1, %c0_i32_0 : i32
    scf.if %2 {
      %cst_14 = arith.constant 0.000000e+00 : f32
      %21 = vector.broadcast %cst_14 : f32 to vector<8x128xf32>
      %c0_15 = arith.constant 0 : index
      %c0_16 = arith.constant 0 : index
      %22 = vector.load %arg7[%c0_15, %c0_16] : memref<8x128xf32, #tpu.memory_space<vmem>>, vector<8x128xf32>
      tpu.vector_store %arg7[%c0_15, %c0_16], %21 {strides = array<i32>} : memref<8x128xf32, #tpu.memory_space<vmem>>, vector<8x128xf32>,
    } else {
    }
    %c0 = arith.constant 0 : index
    %c0_1 = arith.constant 0 : index
    %3 = vector.load %arg2[%c0, %c0_1] : memref<8x128xf32, #tpu.memory_space<vmem>>, vector<8x128xf32>
    %4 = arith.truncf %3 : vector<8x128xf32> to vector<8x128xbf16>
    %5 = arith.extf %4 : vector<8x128xbf16> to vector<8x128xf32>
    %6 = arith.subf %3, %5 : vector<8x128xf32>
    %7 = arith.truncf %6 : vector<8x128xf32> to vector<8x128xbf16>
    %c0_2 = arith.constant 0 : index
    %c0_3 = arith.constant 0 : index
    %8 = vector.load %arg3[%c0_2, %c0_3] : memref<128x128xbf16, #tpu.memory_space<vmem>>, vector<128x128xbf16>
    %c0_4 = arith.constant 0 : index
    %c0_5 = arith.constant 0 : index
    %9 = vector.load %arg4[%c0_4, %c0_5] : memref<128x128xbf16, #tpu.memory_space<vmem>>, vector<128x128xbf16>
    %cst = arith.constant dense<0.000000e+00> : vector<8x128xf32>
    %10 = tpu.matmul %4, %8, %cst {dimension_numbers = #tpu.dot_dimension_numbers<[1], [0], [0], [1], [0, 0, 1, 1], [], []>} : vector<8x128xbf16>, vector<128x128xbf16>, vector<8x128xf32> -> vector<8x128xf32>
    %cst_6 = arith.constant dense<0.000000e+00> : vector<8x128xf32>
    %11 = tpu.matmul %7, %8, %cst_6 {dimension_numbers = #tpu.dot_dimension_numbers<[1], [0], [0], [1], [0, 0, 1, 1], [], []>} : vector<8x128xbf16>, vector<128x128xbf16>, vector<8x128xf32> -> vector<8x128xf32>
    %12 = arith.addf %10, %11 : vector<8x128xf32>
    %cst_7 = arith.constant dense<0.000000e+00> : vector<8x128xf32>
    %13 = tpu.matmul %4, %9, %cst_7 {dimension_numbers = #tpu.dot_dimension_numbers<[1], [0], [0], [1], [0, 0, 1, 1], [], []>} : vector<8x128xbf16>, vector<128x128xbf16>, vector<8x128xf32> -> vector<8x128xf32>
    %14 = arith.addf %12, %13 : vector<8x128xf32>
    %c0_8 = arith.constant 0 : index
    %c0_9 = arith.constant 0 : index
    %15 = vector.load %arg7[%c0_8, %c0_9] : memref<8x128xf32, #tpu.memory_space<vmem>>, vector<8x128xf32>
    %16 = arith.addf %15, %14 : vector<8x128xf32>
    %c0_10 = arith.constant 0 : index
    %c0_11 = arith.constant 0 : index
    %17 = vector.load %arg7[%c0_10, %c0_11] : memref<8x128xf32, #tpu.memory_space<vmem>>, vector<8x128xf32>
    tpu.vector_store %arg7[%c0_10, %c0_11], %16 {strides = array<i32>} : memref<8x128xf32, #tpu.memory_space<vmem>>, vector<8x128xf32>,
    %c0_i32_12 = arith.constant 0 : i32
    %18 = arith.cmpi eq, %arg1, %c0_i32_12 : i32
    %19 = arith.extui %18 : i1 to i32
    %c0_i32_13 = arith.constant 0 : i32
    %20 = arith.cmpi ne, %19, %c0_i32_13 : i32
    scf.if %20 {
      %c0_14 = arith.constant 0 : index
      %c0_15 = arith.constant 0 : index
      %21 = vector.load %arg7[%c0_14, %c0_15] : memref<8x128xf32, #tpu.memory_space<vmem>>, vector<8x128xf32>
      %c0_16 = arith.constant 0 : index
      %c0_17 = arith.constant 0 : index
      %22 = vector.load %arg5[%c0_16, %c0_17] : memref<1x128xf32, #tpu.memory_space<vmem>>, vector<1x128xf32>
      %23 = vector.broadcast %22 : vector<1x128xf32> to vector<8x128xf32>
      %24 = arith.addf %21, %23 : vector<8x128xf32>
      %c0_18 = arith.constant 0 : index
      %c0_19 = arith.constant 0 : index
      %25 = vector.load %arg6[%c0_18, %c0_19] : memref<8x128xf32, #tpu.memory_space<vmem>>, vector<8x128xf32>
      tpu.vector_store %arg6[%c0_18, %c0_19], %24 {strides = array<i32>} : memref<8x128xf32, #tpu.memory_space<vmem>>, vector<8x128xf32>,
    } else {
    }
    return
  }
  func.func @transform_0(%arg0: i32, %arg1: i32) -> (i32, i32) {
    %c0_i32 = arith.constant 0 : i32
    return %arg0, %arg1 : i32, i32
  }
  func.func @transform_1(%arg0: i32, %arg1: i32) -> (i32, i32) {
    %c0_i32 = arith.constant 0 : i32
    %c0_i32_0 = arith.constant 0 : i32
    return %arg1, %c0_i32 : i32, i32
  }
  func.func @transform_2(%arg0: i32, %arg1: i32) -> (i32, i32) {
    %c0_i32 = arith.constant 0 : i32
    %c0_i32_0 = arith.constant 0 : i32
    return %arg1, %c0_i32 : i32, i32
  }
  func.func @transform_3(%arg0: i32, %arg1: i32) -> (i32, i32) {
    %c0_i32 = arith.constant 0 : i32
    %c0_i32_0 = arith.constant 0 : i32
    %c0_i32_1 = arith.constant 0 : i32
    return %c0_i32, %c0_i32_0 : i32, i32
  }
  func.func @transform_4(%arg0: i32, %arg1: i32) -> (i32, i32) {
    %c0_i32 = arith.constant 0 : i32
    %c0_i32_0 = arith.constant 0 : i32
    return %arg0, %c0_i32 : i32, i32
  }
}

</mosaic_0001>

<bundles_post_ra>
// kernel: tpu_custom_call.1
= control target key start
LH: loop header
LB: loop body
LE: loop exit
PB: predicated region body
PF: predicated region fallthrough
CT: control target
= control target key end

     0   :  { %9 = vsyncpa [#allocation4], 0  ;;  %s641_s0 = inlined_call_operand.hbm [shape: f32[8,128], index: 0, kind: input, shape index: {}]   ;;  %s642_s1 = inlined_call_operand.hbm [shape: bf16[128,128], index: 1, kind: input, shape index: {}]   ;;  %s643_s2 = inlined_call_operand.hbm [shape: bf16[128,128], index: 2, kind: input, shape index: {}]   ;;  %s644_s3 = inlined_call_operand.vmem [shape: f32[1,128], index: 3, kind: input, shape index: {}]   ;;  %s645_s4 = inlined_call_operand.hbm [shape: f32[8,128], index: 4, kind: output, shape index: {}]  }
   0x1   :  { %10 = vsyncpa [#allocation7], 0 }
   0x2   :  { %11 = vsyncpa [#allocation5], 0  ;;  %s563_s15 = smov [#allocation6]  }
   0x3   :  { %s27_s16 = sshll.u32 %s563_s15, 4  ;;  %s28_s16 = int_to_ptr.vmem [resolvable:$true] %s27_s16 }
   0x4   :  { %s485_s17 = scalar_lea.vmem %s28_s16, 1024  ;;  %p490_p1 = scmp.lt.s32.totalorder %s28_s16, %s28_s16 }
   0x5   :  { %p486_p0 = scmp.ne.s32.totalorder %s28_s16, %s485_s17  ;;  %p491_p2 = scmp.lt.s32.totalorder %s485_s17, %s485_s17 }
   0x7   :  { %p492_p3 = por %p491_p2, %p490_p1 }
   0x9   :  { %p493_p4 = pnand %p492_p3, %p486_p0 }
   0xb   :  { %496 = shalt.err (!%p493_p4)
}
   0xc   :  { %s564_s18 = smov 64   ;;  %s565_s19 = smov 4  }
   0xd   :  { %33 = dma.hbm_to_vmem [thread:$0]  %s642_s1, 1024, %s28_s16, [#allocation7], %s564_s18, %s564_s18, %s565_s19  }
   0xe   :  { %s566_s22 = smov [#allocation3]   ;;  %s567_s24 = smov [#allocation8]  }
   0xf   :  { %s18_s23 = sshll.u32 %s566_s22, 4  ;;  %s39_s25 = sshll.u32 %s567_s24, 4  ;;  %s19_s23 = int_to_ptr.vmem [resolvable:$true] %s18_s23  ;;  %s40_s25 = int_to_ptr.vmem [resolvable:$true] %s39_s25 }
  0x10   :  { %s505_s26 = scalar_lea.vmem %s19_s23, 128  ;;  %p510_p6 = scmp.lt.s32.totalorder %s19_s23, %s19_s23 }
  0x11   :  { %p506_p5 = scmp.ne.s32.totalorder %s19_s23, %s505_s26  ;;  %p511_p7 = scmp.lt.s32.totalorder %s505_s26, %s505_s26 }
  0x13   :  { %p512_p8 = por %p511_p7, %p510_p6 }
  0x15   :  { %p513_p9 = pnand %p512_p8, %p506_p5 }
  0x17   :  { %516 = shalt.err (!%p513_p9)
}
  0x18   :  { %21 = dma.hbm_to_vmem [thread:$0]  %s641_s0, 128, %s19_s23, [#allocation4]  }
  0x19   :  { %s525_s29 = scalar_lea.vmem %s40_s25, 1024  ;;  %p530_p11 = scmp.lt.s32.totalorder %s40_s25, %s40_s25 }
  0x1a   :  { %p526_p10 = scmp.ne.s32.totalorder %s40_s25, %s525_s29  ;;  %p531_p12 = scmp.lt.s32.totalorder %s525_s29, %s525_s29 }
  0x1c   :  { %p532_p13 = por %p531_p12, %p530_p11 }
  0x1e   :  { %p533_p0 = pnand %p532_p13, %p526_p10 }
  0x20   :  { %536 = shalt.err (!%p533_p0)
}
  0x21   :  { %45 = dma.hbm_to_vmem [thread:$0]  %s643_s2, 1024, %s40_s25, [#allocation7], %s564_s18, %s564_s18, %s565_s19  }
  0x22   :  { %557 = dma.done.wait [#allocation4], 128  }
  0x23   :  { %558 = vsyncadd [#allocation4], 4294967168 }
  0x24   :  { %559 = dma.done.wait [#allocation7], 2048  }
  0x25   :  { %560 = vsyncadd [#allocation7], 4294965248  ;;  %v568_v0 = vmov 0.0   ;;  %vm569_vm0 = vmmov 0   ;;  %v461_v1 = vld [vmem:[#allocation6 + $0x38] sm:$0xff]   ;;  %v462_v2 = vld [vmem:[#allocation6 + $0x30] sm:$0xff]  }
  0x26   :  { %393 = vmatprep.subr.bf16.mxu0 %v568_v0  ;;  %413 = vmatprep.subr.bf16.mxu1 %v568_v0  ;;  %v463_v3 = vld [vmem:[#allocation6 + $0x28] sm:$0xff]   ;;  %v464_v4 = vld [vmem:[#allocation6 + $0x20] sm:$0xff]   ;;  %v465_v5 = vld [vmem:[#allocation6 + $0x18] sm:$0xff]   ;;  %s570_s5 = smov [#allocation9]  }
  0x27   :  { %409 = vmatprep.mubr.msk.bf16.mxu0 %vm569_vm0, %v568_v0  ;;  %429 = vmatprep.mubr.msk.bf16.mxu1 %vm569_vm0, %v568_v0  ;;  %v63_v6 = vld [vmem:[#allocation3] sm:$0xff]  ;;  %v466_v8 = vld [vmem:[#allocation6 + $0x10] sm:$0xff]   ;;  %v467_v10 = vld [vmem:[#allocation6 + $0x8] sm:$0xff]   ;;  %s339_s6 = sshll.u32 %s570_s5, 4  ;;  %s340_s6 = int_to_ptr.vmem [resolvable:$true] %s339_s6 }
  0x28   :  { %394 = vmatpush3.bf16.msra.mxu0 %v461_v1  ;;  %414 = vmatpush3.bf16.msra.mxu1 %v461_v1  ;;  %v64_v7 = vpack.c.bf16 %v63_v6, %v63_v6  ;;  %v468_v12 = vld [vmem:[#allocation6] sm:$0xff]   ;;  %v469_v14 = vld [vmem:[#allocation8 + $0x38] sm:$0xff]   ;;  %v470_v15 = vld [vmem:[#allocation8 + $0x30] sm:$0xff]   ;;  %s537_s7 = scalar_lea.vmem %s340_s6, 128  ;;  %p542_p2 = scmp.lt.s32.totalorder %s340_s6, %s340_s6 }
  0x29   :  { %395 = vmatprep.subr.bf16.mxu0 %v568_v0  ;;  %415 = vmatprep.subr.bf16.mxu1 %v568_v0  ;;  %v471_v16 = vld [vmem:[#allocation8 + $0x28] sm:$0xff]   ;;  %v472_v17 = vld [vmem:[#allocation8 + $0x20] sm:$0xff]   ;;  %v473_v18 = vld [vmem:[#allocation8 + $0x18] sm:$0xff]   ;;  %p538_p1 = scmp.ne.s32.totalorder %s340_s6, %s537_s7  ;;  %p543_p3 = scmp.lt.s32.totalorder %s537_s7, %s537_s7 }
  0x2a   :  { %v65_v9 = vunpack.c.l.bf16 %v64_v7  ;;  %v474_v19 = vld [vmem:[#allocation8 + $0x10] sm:$0xff]   ;;  %v475_v20 = vld [vmem:[#allocation8 + $0x8] sm:$0xff]   ;;  %v476_v21 = vld [vmem:[#allocation8] sm:$0xff]  }
  0x2b   :  { %v365_v32 = vld [vmem:[%s644_s3] ss:$0 sm:$0xff]  ;;  %p544_p4 = por %p543_p3, %p542_p2 }
  0x2c   :  { %396 = vmatpush3.bf16.msra.mxu0 %v462_v2  ;;  %416 = vmatpush3.bf16.msra.mxu1 %v462_v2  ;;  %v66_v11 = vsub.f32 %v63_v6, %v65_v9 }
  0x2d   :  { %397 = vmatprep.subr.bf16.mxu0 %v568_v0  ;;  %417 = vmatprep.subr.bf16.mxu1 %v568_v0  ;;  %p545_p5 = pnand %p544_p4, %p538_p1 }
  0x2e   :  { %v67_v13 = vpack.c.bf16 %v66_v11, %v66_v11 }
  0x30   :  { %398 = vmatpush3.bf16.msra.mxu0 %v463_v3  ;;  %418 = vmatpush3.bf16.msra.mxu1 %v463_v3 }
  0x31   :  { %399 = vmatprep.subr.bf16.mxu0 %v568_v0  ;;  %419 = vmatprep.subr.bf16.mxu1 %v568_v0 }
  0x34   :  { %400 = vmatpush3.bf16.msra.mxu0 %v464_v4  ;;  %420 = vmatpush3.bf16.msra.mxu1 %v464_v4 }
  0x35   :  { %401 = vmatprep.subr.bf16.mxu0 %v568_v0  ;;  %421 = vmatprep.subr.bf16.mxu1 %v568_v0 }
  0x38   :  { %402 = vmatpush3.bf16.msra.mxu0 %v465_v5  ;;  %422 = vmatpush3.bf16.msra.mxu1 %v465_v5 }
  0x39   :  { %403 = vmatprep.subr.bf16.mxu0 %v568_v0  ;;  %423 = vmatprep.subr.bf16.mxu1 %v568_v0 }
  0x3c   :  { %404 = vmatpush3.bf16.msra.mxu0 %v466_v8  ;;  %424 = vmatpush3.bf16.msra.mxu1 %v466_v8 }
  0x3d   :  { %405 = vmatprep.subr.bf16.mxu0 %v568_v0  ;;  %425 = vmatprep.subr.bf16.mxu1 %v568_v0 }
  0x40   :  { %406 = vmatpush3.bf16.msra.mxu0 %v467_v10  ;;  %426 = vmatpush3.bf16.msra.mxu1 %v467_v10 }
  0x41   :  { %407 = vmatprep.subr.bf16.mxu0 %v568_v0  ;;  %427 = vmatprep.subr.bf16.mxu1 %v568_v0 }
  0x44   :  { %408 = vmatpush3.bf16.msra.mxu0 %v468_v12  ;;  %428 = vmatpush3.bf16.msra.mxu1 %v468_v12 }
  0x45   :  { %433 = vmatprep.subr.bf16.mxu0 %v568_v0 }
  0x47   :  { %410 = vmatmul.mubr.bf16.vlgmr.msra.gmra.mxu0 %v67_v13  ;;  %430 = vmatmul.mubr.bf16.vlgmr.msra.gmra.mxu1 %v64_v7 }
  0x48   :  { %434 = vmatpush3.bf16.msra.mxu0 %v469_v14  ;;  %449 = vmatprep.mubr.msk.bf16.mxu0 %vm569_vm0, %v568_v0 }
  0x49   :  { %435 = vmatprep.subr.bf16.mxu0 %v568_v0 }
  0x4c   :  { %436 = vmatpush3.bf16.msra.mxu0 %v470_v15 }
  0x4d   :  { %437 = vmatprep.subr.bf16.mxu0 %v568_v0 }
  0x50   :  { %438 = vmatpush3.bf16.msra.mxu0 %v471_v16 }
  0x51   :  { %439 = vmatprep.subr.bf16.mxu0 %v568_v0 }
  0x54   :  { %440 = vmatpush3.bf16.msra.mxu0 %v472_v17 }
  0x55   :  { %441 = vmatprep.subr.bf16.mxu0 %v568_v0 }
  0x58   :  { %442 = vmatpush3.bf16.msra.mxu0 %v473_v18 }
  0x59   :  { %443 = vmatprep.subr.bf16.mxu0 %v568_v0 }
  0x5c   :  { %444 = vmatpush3.bf16.msra.mxu0 %v474_v19 }
  0x5d   :  { %445 = vmatprep.subr.bf16.mxu0 %v568_v0 }
  0x60   :  { %446 = vmatpush3.bf16.msra.mxu0 %v475_v20 }
  0x61   :  { %447 = vmatprep.subr.bf16.mxu0 %v568_v0 }
  0x64   :  { %448 = vmatpush3.bf16.msra.mxu0 %v476_v21 }
  0x67   :  { %450 = vmatmul.mubr.bf16.vlgmr.msra.gmra.mxu0 %v64_v7 }
 0x107   :  { %v182_v22 = vpop.f32.mrf.mxu0  ;;  %v222_v23 = vpop.f32.mrf.mxu1 }
 0x108   :  { %v223_v30 = vadd.f32 %v222_v23, %v182_v22 }
 0x109   :  { %v411_v24 = vpop.f32.mrf.mxu0  ;;  %v431_v25 = vpop.f32.mrf.mxu1 }
 0x10b   :  { %v185_v26 = vpop.f32.mrf.mxu0  ;;  %v225_v27 = vpop.f32.mrf.mxu1 }
 0x10d   :  { %v412_v28 = vpop.f32.mrf.mxu0  ;;  %v432_v29 = vpop.f32.mrf.mxu1 }
 0x127   :  { %v310_v31 = vpop.f32.mrf.mxu0 }
 0x128   :  { %v316_v33 = vadd.f32 %v310_v31, %v223_v30 }
 0x129   :  { %v451_v34 = vpop.f32.mrf.mxu0 }
 0x12a   :  { %v331_v35 = vadd.f32 %v365_v32, %v316_v33 }
 0x12b   :  { %v313_v36 = vpop.f32.mrf.mxu0 }
 0x12c   :  { %332 = vst [vmem:[#allocation9] sm:$0xff] %v331_v35 }
 0x12d   :  { %v452_v37 = vpop.f32.mrf.mxu0 }
 0x12e   :  { %548 = shalt.err (!%p545_p5)
}
 0x12f   :  { %342 = dma.vmem_to_hbm [thread:$0]  %s340_s6, 128, %s645_s4, [#allocation5]  }
 0x130   :  { %561 = dma.done.wait [#allocation5], 128  }
 0x131   :  { %562 = vsyncadd [#allocation5], 4294967168 }
 0x132   :  { %346 = vsyncpa [#allocation4], 1 }
 0x133   :  { %347 = vsyncpa [#allocation7], 1 }
 0x134   :  { %348 = vsyncpa [#allocation5], 1 }

</bundles_post_ra>
